<compile_context>
chip_gen: v7x
topology: tpu7x:2x2x1
jax: 0.10.0
libtpu: 0.0.40
codegen_flags: <defaults>
</compile_context>

<pallas_src>
import functools

import jax
import jax.numpy as jnp
from jax.experimental import pallas as pl
from jax.experimental.pallas import tpu as pltpu


_VMEM_LIMIT_BYTES = 32 * 1024 * 1024  # safe on v5e/v6e (128 MiB) and v7x (64 MiB)
_TILE_BYTE_BUDGET = 4 * 1024 * 1024   # per-array per-buffer tile budget
_MAX_HW_TILE = 2048                   # lanes per block upper bound


def _gap_sum_kernel(x_ref, sum_ref):
    """Accumulate per-(batch, channel) spatial sums across HW tiles.

    x_ref:   (1, C, HW_TILE)  native dtype
    sum_ref: (1, C, 1)        f32, resident across the HW-tile (last) grid axis
    """
    @pl.when(pl.program_id(1) == 0)
    def _():
        sum_ref[...] = jnp.zeros_like(sum_ref)

    x = x_ref[...].astype(jnp.float32)
    sum_ref[...] += jnp.sum(x, axis=-1, keepdims=True)


def _scale_kernel(x_ref, a_ref, o_ref):
    """out = x * log_softmax(channel attention), broadcast along spatial lanes.

    x_ref: (1, C, HW_TILE) native dtype
    a_ref: (1, C, 1)       f32 log-softmax attention for this batch element
    o_ref: (1, C, HW_TILE) native dtype
    """
    x = x_ref[...].astype(jnp.float32)
    o_ref[...] = (x * a_ref[...]).astype(o_ref.dtype)


def _pick_hw_tile(hw, c, itemsize):
    """Lane-dense HW tile: multiple of 128, capped by a per-buffer VMEM budget."""
    hw_128 = ((hw + 127) // 128) * 128
    budget_lanes = max(128, (_TILE_BYTE_BUDGET // (c * itemsize)) // 128 * 128)
    return min(hw_128, _MAX_HW_TILE, budget_lanes)


@functools.partial(jax.jit, static_argnames=())
def channel_wise_attention(feature_map, w_dfc, b_dfc, w_ufc, b_ufc):
    """feature_map: (N, C, H, W). Weights in PyTorch Linear layout
    (out_features, in_features); transposed here for x @ W form."""
    N, C, H, W = feature_map.shape
    HW = H * W
    dtype = feature_map.dtype
    itemsize = jnp.dtype(dtype).itemsize

    hw_tile = _pick_hw_tile(HW, C, itemsize)
    hw_pad = pl.cdiv(HW, hw_tile) * hw_tile
    n_hw_tiles = hw_pad // hw_tile

    # Stream the feature map in its native dtype; no wrapper-side f32 upcast.
    x3 = feature_map.reshape(N, C, HW)
    if hw_pad != HW:
        # Zero padding is safe: zeros do not change the spatial sum, and the
        # padded output lanes are sliced off before returning.
        x3 = jnp.pad(x3, ((0, 0), (0, 0), (0, hw_pad - HW)))

    # ---------------- Pass A: tiled global-average-pool (sum) ----------------
    sums = pl.pallas_call(
        _gap_sum_kernel,
        out_shape=jax.ShapeDtypeStruct((N, C, 1), jnp.float32),
        grid=(N, n_hw_tiles),
        in_specs=[pl.BlockSpec((1, C, hw_tile), lambda n, t: (n, 0, t))],
        out_specs=pl.BlockSpec((1, C, 1), lambda n, t: (n, 0, 0)),
        compiler_params=pltpu.CompilerParams(
            dimension_semantics=("parallel", "arbitrary"),
            vmem_limit_bytes=_VMEM_LIMIT_BYTES),
    )(x3)

    # -------- Tiny FC / tanh / FC / log_softmax: (N, C)-sized, plain JAX -----
    cv = sums[:, :, 0] * (1.0 / float(HW))                       # (N, C) f32
    w1 = jnp.transpose(w_dfc).astype(jnp.float32)                # (C, C//2)
    b1 = b_dfc.astype(jnp.float32)                               # (C//2,)
    w2 = jnp.transpose(w_ufc).astype(jnp.float32)                # (C//2, C)
    b2 = b_ufc.astype(jnp.float32)                               # (C,)

    h = jnp.tanh(cv @ w1 + b1)                                   # (N, C//2)
    logits = h @ w2 + b2                                         # (N, C)
    log_sm = jax.nn.log_softmax(logits, axis=1)                  # (N, C) f32

    # ---------------- Pass B: tiled elementwise scale ------------------------
    out3 = pl.pallas_call(
        _scale_kernel,
        out_shape=jax.ShapeDtypeStruct((N, C, hw_pad), dtype),
        grid=(N, n_hw_tiles),
        in_specs=[
            pl.BlockSpec((1, C, hw_tile), lambda n, t: (n, 0, t)),
            pl.BlockSpec((1, C, 1), lambda n, t: (n, 0, 0)),
        ],
        out_specs=pl.BlockSpec((1, C, hw_tile), lambda n, t: (n, 0, t)),
        compiler_params=pltpu.CompilerParams(
            dimension_semantics=("parallel", "parallel"),
            vmem_limit_bytes=_VMEM_LIMIT_BYTES),
    )(x3, log_sm[:, :, None])

    attended_fm = out3[:, :, :HW].reshape(N, C, H, W)
    # The attention map is a pure broadcast of N*C scalars -> do it in the
    # wrapper instead of burning a full N*C*HW HBM write inside the kernel.
    channel_attention = jnp.broadcast_to(
        log_sm.astype(dtype)[:, :, None, None], (N, C, H, W))
    return attended_fm, channel_attention


def _reference(feature_map, w_dfc, b_dfc, w_ufc, b_ufc):
    N, C, H, W = feature_map.shape
    cv = jnp.mean(feature_map, axis=(2, 3))                      # (N, C)
    h = jnp.tanh(cv @ w_dfc.T + b_dfc)
    logits = h @ w_ufc.T + b_ufc
    log_sm = jax.nn.log_softmax(logits, axis=1)
    att = jnp.broadcast_to(log_sm[:, :, None, None], (N, C, H, W))
    return feature_map * att, att


if __name__ == "__main__":
    key = jax.random.PRNGKey(0)
    N, C, H, W = 2, 4, 16, 16
    k_x, k_w1, k_b1, k_w2, k_b2 = jax.random.split(key, 5)

    feature_map = jax.random.normal(k_x, (N, C, H, W), dtype=jnp.float32)
    # Deterministic parameter init (PyTorch Linear shapes: (out, in)).
    w_dfc = jax.random.normal(k_w1, (C // 2, C), dtype=jnp.float32) * 0.5
    b_dfc = jax.random.normal(k_b1, (C // 2,), dtype=jnp.float32) * 0.1
    w_ufc = jax.random.normal(k_w2, (C, C // 2), dtype=jnp.float32) * 0.5
    b_ufc = jax.random.normal(k_b2, (C,), dtype=jnp.float32) * 0.1

    attended, attention = channel_wise_attention(
        feature_map, w_dfc, b_dfc, w_ufc, b_ufc)
    attended = jax.block_until_ready(attended)
    attention = jax.block_until_ready(attention)

    ref_out, ref_att = _reference(feature_map, w_dfc, b_dfc, w_ufc, b_ufc)
    assert jnp.allclose(attended, ref_out, atol=1e-5, rtol=1e-5)
    assert jnp.allclose(attention, ref_att, atol=1e-5, rtol=1e-5)

    print("KERNEL_OK")
</pallas_src>

<mosaic_0001>
module attributes {stable_mosaic.version = 11 : i64} {
  func.func @_gap_sum_kernel(%arg0: i32, %arg1: i32, %arg2: memref<1x4x256xf32, #tpu.memory_space<vmem>>, %arg3: memref<1x4x1xf32, #tpu.memory_space<vmem>>) attributes {dimension_semantics = [#tpu.dimension_semantics<parallel>, #tpu.dimension_semantics<arbitrary>], iteration_bounds = array<i64: 2, 1>, scalar_prefetch = 0 : i64, scratch_operands = 0 : i64, tpu.core_type = #tpu.core_type<tc>, window_params = [{transform_indices = @transform_0, window_bounds = array<i64: 1, 4, 256>}, {transform_indices = @transform_1, window_bounds = array<i64: 1, 4, 1>}]} {
    %c0_i32 = arith.constant 0 : i32
    %0 = arith.cmpi eq, %arg1, %c0_i32 : i32
    %1 = arith.extui %0 : i1 to i32
    %c0_i32_0 = arith.constant 0 : i32
    %2 = arith.cmpi ne, %1, %c0_i32_0 : i32
    scf.if %2 {
      %cst_9 = arith.constant 0.000000e+00 : f32
      %9 = vector.broadcast %cst_9 : f32 to vector<1x4x1xf32>
      %c0_10 = arith.constant 0 : index
      %c0_11 = arith.constant 0 : index
      %c0_12 = arith.constant 0 : index
      %10 = vector.load %arg3[%c0_10, %c0_11, %c0_12] : memref<1x4x1xf32, #tpu.memory_space<vmem>>, vector<1x4x1xf32>
      tpu.vector_store %arg3[%c0_10, %c0_11, %c0_12], %9 {strides = array<i32>} : memref<1x4x1xf32, #tpu.memory_space<vmem>>, vector<1x4x1xf32>,
    } else {
    }
    %c0 = arith.constant 0 : index
    %c0_1 = arith.constant 0 : index
    %c0_2 = arith.constant 0 : index
    %3 = vector.load %arg2[%c0, %c0_1, %c0_2] : memref<1x4x256xf32, #tpu.memory_space<vmem>>, vector<1x4x256xf32>
    %c0_3 = arith.constant 0 : index
    %c0_4 = arith.constant 0 : index
    %c0_5 = arith.constant 0 : index
    %4 = vector.load %arg3[%c0_3, %c0_4, %c0_5] : memref<1x4x1xf32, #tpu.memory_space<vmem>>, vector<1x4x1xf32>
    %cst = arith.constant dense<0.000000e+00> : vector<1x4xf32>
    %5 = vector.multi_reduction <add>, %3, %cst [2] : vector<1x4x256xf32> to vector<1x4xf32>
    %6 = vector.shape_cast %5 : vector<1x4xf32> to vector<1x4x1xf32>
    %7 = arith.addf %4, %6 : vector<1x4x1xf32>
    %c0_6 = arith.constant 0 : index
    %c0_7 = arith.constant 0 : index
    %c0_8 = arith.constant 0 : index
    %8 = vector.load %arg3[%c0_6, %c0_7, %c0_8] : memref<1x4x1xf32, #tpu.memory_space<vmem>>, vector<1x4x1xf32>
    tpu.vector_store %arg3[%c0_6, %c0_7, %c0_8], %7 {strides = array<i32>} : memref<1x4x1xf32, #tpu.memory_space<vmem>>, vector<1x4x1xf32>,
    return
  }
  func.func @transform_0(%arg0: i32, %arg1: i32) -> (i32, i32, i32) {
    %c0_i32 = arith.constant 0 : i32
    %c0_i32_0 = arith.constant 0 : i32
    return %arg0, %c0_i32, %arg1 : i32, i32, i32
  }
  func.func @transform_1(%arg0: i32, %arg1: i32) -> (i32, i32, i32) {
    %c0_i32 = arith.constant 0 : i32
    %c0_i32_0 = arith.constant 0 : i32
    %c0_i32_1 = arith.constant 0 : i32
    return %arg0, %c0_i32, %c0_i32_0 : i32, i32, i32
  }
}

module attributes {stable_mosaic.version = 11 : i64} {
  func.func @_scale_kernel(%arg0: i32, %arg1: i32, %arg2: memref<1x4x256xf32, #tpu.memory_space<vmem>>, %arg3: memref<1x4x1xf32, #tpu.memory_space<vmem>>, %arg4: memref<1x4x256xf32, #tpu.memory_space<vmem>>) attributes {dimension_semantics = [#tpu.dimension_semantics<parallel>, #tpu.dimension_semantics<parallel>], iteration_bounds = array<i64: 2, 1>, scalar_prefetch = 0 : i64, scratch_operands = 0 : i64, tpu.core_type = #tpu.core_type<tc>, window_params = [{transform_indices = @transform_0, window_bounds = array<i64: 1, 4, 256>}, {transform_indices = @transform_1, window_bounds = array<i64: 1, 4, 1>}, {transform_indices = @transform_2, window_bounds = array<i64: 1, 4, 256>}]} {
    %c0 = arith.constant 0 : index
    %c0_0 = arith.constant 0 : index
    %c0_1 = arith.constant 0 : index
    %0 = vector.load %arg2[%c0, %c0_0, %c0_1] : memref<1x4x256xf32, #tpu.memory_space<vmem>>, vector<1x4x256xf32>
    %c0_2 = arith.constant 0 : index
    %c0_3 = arith.constant 0 : index
    %c0_4 = arith.constant 0 : index
    %1 = vector.load %arg3[%c0_2, %c0_3, %c0_4] : memref<1x4x1xf32, #tpu.memory_space<vmem>>, vector<1x4x1xf32>
    %2 = vector.broadcast %1 : vector<1x4x1xf32> to vector<1x4x256xf32>
    %3 = arith.mulf %0, %2 : vector<1x4x256xf32>
    %c0_5 = arith.constant 0 : index
    %c0_6 = arith.constant 0 : index
    %c0_7 = arith.constant 0 : index
    %4 = vector.load %arg4[%c0_5, %c0_6, %c0_7] : memref<1x4x256xf32, #tpu.memory_space<vmem>>, vector<1x4x256xf32>
    tpu.vector_store %arg4[%c0_5, %c0_6, %c0_7], %3 {strides = array<i32>} : memref<1x4x256xf32, #tpu.memory_space<vmem>>, vector<1x4x256xf32>,
    return
  }
  func.func @transform_0(%arg0: i32, %arg1: i32) -> (i32, i32, i32) {
    %c0_i32 = arith.constant 0 : i32
    %c0_i32_0 = arith.constant 0 : i32
    return %arg0, %c0_i32, %arg1 : i32, i32, i32
  }
  func.func @transform_1(%arg0: i32, %arg1: i32) -> (i32, i32, i32) {
    %c0_i32 = arith.constant 0 : i32
    %c0_i32_0 = arith.constant 0 : i32
    %c0_i32_1 = arith.constant 0 : i32
    return %arg0, %c0_i32, %c0_i32_0 : i32, i32, i32
  }
  func.func @transform_2(%arg0: i32, %arg1: i32) -> (i32, i32, i32) {
    %c0_i32 = arith.constant 0 : i32
    %c0_i32_0 = arith.constant 0 : i32
    return %arg0, %c0_i32, %arg1 : i32, i32, i32
  }
}

</mosaic_0001>

<bundles_post_ra>
// kernel: channel_wise_attention.2
= control target key start
LH: loop header
LB: loop body
LE: loop exit
PB: predicated region body
PF: predicated region fallthrough
CT: control target
= control target key end

     0   :  { %s302_s6 = smov 0   ;;  %s304_s7 = smov 0   ;;  %s334_s0 = inlined_call_operand.vmem [shape: f32[2,4,256], index: 0, kind: input, shape index: {}]   ;;  %s335_s1 = inlined_call_operand.vmem [shape: f32[2,4,1], index: 1, kind: output, shape index: {}]  }
   0x1   :  { %s306_s8 = smov 0  }
   0x2 LB: > { %s23_s9 = sadd.s32 1, %s285_s7  ;;  %p234_p0 = scmp.ge.s32.totalorder %s289_s8, 1  ;;  %s289_s8 = sphi %s306_s8, %s11_s8   ;;  %s285_s7 = sphi %s304_s7, %s337_s7   ;;  %s281_s6 = sphi %s302_s6, %s336_s6  }
   0x3   : > { %p25_p1 = scmp.ge.s32.totalorder %s23_s9, 2  ;;  %p106_p2 = scmp.lt.s32.totalorder %s289_s8, 3 }
   0x5   : > { %s339_s9 = smov (%p25_p1, %s23_s9), 0  ;;  %p107_p3 = pnand %p234_p0, %p106_p2 }
   0x6   : > { %p130_p4 = scmp.lt.s32.totalorder (!%p107_p3), %s281_s6, 1  ;;  %vm147_vm0 = vcmask (!%p107_p3), 3072   ;;  %vm154_vm1 = vcmask (!%p107_p3), 1043456   ;;  %v291_v1 = vmov (!%p107_p3), 0.0  }
   0x7   : > { %110 = sbr.rel (%p107_p3) target bundleno = 168 (0xa8), region = 24 }
   0xe   : > { %s341_s6 = smov (!%p130_p4, %s281_s6), 1 }
   0xf   : > { %s240_s10 = sshll.u32 %s341_s6, 3  ;;  %s237_s11 = sshll.u32 %s341_s6, 2 }
  0x10   : > { %s137_s14 = scalar_lea.vmem %s334_s0, %s240_s10  ;;  %s142_s17 = scalar_lea.vmem %s335_s1, %s237_s11 }
  0x11   : > { %v149_v0 = vld [vmem:[%s137_s14] sm:$0xff]  ;;  %148 = vst.msk [vmem:[%s142_s17] sm:$0xf] %vm147_vm0, %v291_v1 }
  0x12   : > { %v152_v2 = vcombine.high %v149_v0, %v149_v0  ;;  %v155_v3 = vsel %vm154_vm1, %v149_v0, 0.0 }
  0x14   : > { %v156_v4 = vsel %vm154_vm1, %v152_v2, 0.0 }
  0x15   : > { %v157_v5 = vadd.f32 %v156_v4, %v155_v3 }
  0x17   : > { %158 = vadd.xlane.f32.xlu0 %v157_v5 }
  0x18   : > { %v150_v6 = vld [vmem:[%s142_s17] sm:$0xf] }
  0xa4   : > { %v159_v7 = vpop.xlane.xlu0 %158 }
  0xa5   : > { %v160_v8 = vadd.f32 %v159_v7, %v150_v6 }
  0xa7   : > { %162 = vst.msk [vmem:[%s142_s17] sm:$0xf] %vm147_vm0, %v160_v8 }
  0xa8 PF: > { %s11_s8 = sadd.s32 1, %s289_s8   ;;  %s336_s6 = smov %s285_s7 }
  0xa9   : > { %p8_p5 = scmp.ge.s32.totalorder %s11_s8, 4   ;;  %s337_s7 = smov %s339_s9 }
  0xab   :  { %10 = sbr.rel (!%p8_p5) target bundleno = 2 (0x2), region = 58 }

// kernel: channel_wise_attention.3
= control target key start
LH: loop header
LB: loop body
LE: loop exit
PB: predicated region body
PF: predicated region fallthrough
CT: control target
= control target key end

     0   :  { %s397_s9 = smov 0   ;;  %s399_s10 = smov 0   ;;  %s430_s0 = inlined_call_operand.vmem [shape: f32[2,4,256], index: 0, kind: input, shape index: {}]   ;;  %s431_s1 = inlined_call_operand.vmem [shape: f32[2,4,1], index: 1, kind: input, shape index: {}]   ;;  %s432_s2 = inlined_call_operand.vmem [shape: f32[2,4,256], index: 2, kind: output, shape index: {}]  }
   0x1   :  { %s401_s11 = smov 0  }
   0x2 LB: > { %s24_s12 = sadd.s32 1, %s374_s10  ;;  %p319_p0 = scmp.ge.s32.totalorder %s378_s11, 1  ;;  %s378_s11 = sphi %s401_s11, %s12_s11   ;;  %s374_s10 = sphi %s399_s10, %s434_s10   ;;  %s370_s9 = sphi %s397_s9, %s433_s9  }
   0x3   : > { %p26_p1 = scmp.ge.s32.totalorder %s24_s12, 2  ;;  %p142_p2 = scmp.lt.s32.totalorder %s378_s11, 3 }
   0x5   : > { %s436_s12 = smov (%p26_p1, %s24_s12), 0  ;;  %p143_p3 = pnand %p319_p0, %p142_p2 }
   0x6   : > { %p177_p4 = scmp.lt.s32.totalorder (!%p143_p3), %s370_s9, 1  ;;  %v380_v0 = vmov (!%p143_p3), 0   ;;  %v381_v2 = vmov (!%p143_p3), 839922192   ;;  %v209_v4 = vlaneseq (!%p143_p3) }
   0x7   : > { %146 = sbr.rel (%p143_p3) target bundleno = 151 (0x97), region = 28  ;;  %355 = vset.pattern.permute.xlu0 (!%p143_p3), %v380_v0  ;;  %v207_v3 = vunpack.c.l.s4 (!%p143_p3), %v381_v2 }
   0x8   : > { %v210_v6 = vshrl.u32 (!%p143_p3), %v209_v4, 7 }
   0x9   : > { %v208_v5 = vunpack.c.0.s8 (!%p143_p3), %v207_v3 }
   0xb   : > { %v211_v7 = vsub.s32 (!%p143_p3), %v208_v5, %v210_v6 }
   0xe   : > { %s438_s9 = smov (!%p177_p4, %s370_s9), 1 }
   0xf   : > { %s322_s13 = sshll.u32 %s438_s9, 2  ;;  %s327_s17 = sshll.u32 %s438_s9, 3 }
  0x10   : > { %s189_s16 = scalar_lea.vmem %s431_s1, %s322_s13  ;;  %s184_s20 = scalar_lea.vmem %s430_s0, %s327_s17 }
  0x11   : > { %v201_v1 = vld [vmem:[%s189_s16] sm:$0xf]  ;;  %s198_s23 = scalar_lea.vmem %s432_s2, %s327_s17 }
  0x12   : > { %204 = vperm.xlu0 %355, %v201_v1   ;;  %v200_v9 = vld [vmem:[%s184_s20] sm:$0xff] }
  0x91   : > { %v205_v8 = vpop.permute.xlu0 %204 }
  0x92   : > { %v212_v10 = vrot.slane %v205_v8, %v211_v7 }
  0x94   : > { %v214_v11 = vmul.f32 %v212_v10, %v200_v9 }
  0x96   : > { %215 = vst [vmem:[%s198_s23] sm:$0xff] %v214_v11 }
  0x97 PF: > { %s12_s11 = sadd.s32 1, %s378_s11   ;;  %s433_s9 = smov %s374_s10 }
  0x98   : > { %p9_p5 = scmp.ge.s32.totalorder %s12_s11, 4   ;;  %s434_s10 = smov %s436_s12 }
  0x9a   :  { %11 = sbr.rel (!%p9_p5) target bundleno = 2 (0x2), region = 61 }

</bundles_post_ra>
